<compile_context>
chip_gen: v7x
topology: tpu7x:2x2x1
jax: 0.10.0
libtpu: 0.0.40
codegen_flags: <defaults>
</compile_context>

<pallas_src>
import jax
import jax.numpy as jnp
from jax.experimental import pallas as pl
from jax.experimental.pallas import tpu as pltpu

LANE = 128
_VMEM_LIMIT_BYTES = 32 * 1024 * 1024     # explicit scoped-VMEM budget (fits v5e/v6e/v7x)
_VMEM_STEP_BUDGET = 24 * 1024 * 1024     # double-buffered in+out footprint cap
_SMALL_STEP_BYTES = 1 << 20              # below this, don't bother splitting for megacore
_MAX_BATCH_BLOCK = 32                    # bound the static unroll over batch


def conv1x1_sigmoid_kernel(x_ref, w_ref, b_ref, o_ref):
    # x_ref: (bn, C_in, T)  w_ref: (C_out, C_in)  b_ref: (C_out, 1)  o_ref: (bn, C_out, T)
    w = w_ref[...]
    b = b_ref[...]                                   # (C_out, 1) broadcasts over lanes
    for n in range(x_ref.shape[0]):                  # small static unroll over batch
        acc = jnp.dot(w, x_ref[n], preferred_element_type=jnp.float32)
        # sigmoid's exp/recip run on the EUP slot; the kernel stays DMA-bound.
        o_ref[n] = jax.nn.sigmoid(acc + b).astype(o_ref.dtype)


def _round_up(v, m):
    return ((v + m - 1) // m) * m


def conv1x1_sigmoid(x_nchw, weight, bias, *, tile_hw=16384):
    """1x1 Conv2d (stride=1, pad=0) + sigmoid.

    x_nchw: (N, C_in, H, W)   weight: (C_out, C_in)   bias: (C_out,)
    Output dtype follows x_nchw.dtype (pass bf16 in -> bf16 out; acc stays f32).
    """
    N, C_in, H, W = x_nchw.shape
    C_out = weight.shape[0]
    HW = H * W
    itemsize = jnp.dtype(x_nchw.dtype).itemsize

    # Free reshape: NCHW is already contiguous as (N, C_in, H*W).
    x = x_nchw.reshape(N, C_in, HW)
    b = bias.reshape(C_out, 1)

    # Lane-dense stores: pad H*W up to a multiple of 128 when needed (rare; one cheap
    # pad pass), sliced back after the kernel.
    HW_p = _round_up(HW, LANE)
    if HW_p != HW:
        x = jnp.pad(x, ((0, 0), (0, 0), (0, HW_p - HW)))

    # Fold (a bounded chunk of) the batch into the block to amortize per-step overhead.
    bn = min(N, _MAX_BATCH_BLOCK)
    bytes_per_pixel = bn * (C_in + C_out) * itemsize

    # Largest lane-aligned HW tile that keeps the double-buffered footprint in budget.
    t_vmem = max(LANE, (_VMEM_STEP_BUDGET // (2 * bytes_per_pixel)) // LANE * LANE)
    t = min(tile_hw, HW_p, t_vmem)
    t = max(LANE, (t // LANE) * LANE)

    # v7x megacore: if everything would collapse to a single grid step but the problem
    # is big enough to be worth splitting, halve the HW tile so 2 parallel steps exist.
    n_blocks = pl.cdiv(N, bn)
    if (n_blocks == 1 and t >= HW_p and HW_p >= 2 * LANE
            and bytes_per_pixel * HW_p > _SMALL_STEP_BYTES):
        t = ((HW_p // LANE + 1) // 2) * LANE
    num_tiles = pl.cdiv(HW_p, t)

    # NOTE: remainder tiles (HW_p % t != 0 or N % bn != 0) compute sigmoid on
    # out-of-bounds lanes/rows; correctness relies on Pallas' masked stores for the
    # overhanging output block — do not replace the block store with manual stores.
    out = pl.pallas_call(
        conv1x1_sigmoid_kernel,
        out_shape=jax.ShapeDtypeStruct((N, C_out, HW_p), x_nchw.dtype),
        grid_spec=pltpu.PrefetchScalarGridSpec(
            num_scalar_prefetch=0,
            grid=(n_blocks, num_tiles),
            in_specs=[
                pl.BlockSpec((bn, C_in, t), lambda i, j: (i, 0, j)),
                pl.BlockSpec((C_out, C_in), lambda i, j: (0, 0)),
                pl.BlockSpec((C_out, 1), lambda i, j: (0, 0)),
            ],
            out_specs=pl.BlockSpec((bn, C_out, t), lambda i, j: (i, 0, j)),
        ),
        compiler_params=pltpu.CompilerParams(
            dimension_semantics=("parallel", "parallel"),
            vmem_limit_bytes=_VMEM_LIMIT_BYTES,
        ),
    )(x, weight, b)

    if HW_p != HW:
        out = out[:, :, :HW]
    return out.reshape(N, C_out, H, W)


def _reference(x, weight, bias):
    return jax.nn.sigmoid(
        jnp.einsum("nchw,oc->nohw", x, weight) + bias[None, :, None, None]
    )


if __name__ == "__main__":
    key = jax.random.PRNGKey(0)
    k_x, k_w, k_b, k_x2, k_x3 = jax.random.split(key, 5)

    # Conv2d(32, 32, 1): deterministic params (PyTorch-style uniform fan-in init scale).
    C = 32
    fan_in = C * 1 * 1
    bound = 1.0 / jnp.sqrt(fan_in)
    weight = jax.random.uniform(k_w, (C, C), minval=-bound, maxval=bound,
                                dtype=jnp.float32)   # (C_out, C_in) for the 1x1 kernel
    bias = jax.random.uniform(k_b, (C,), minval=-bound, maxval=bound,
                              dtype=jnp.float32)

    # Small shapes consistent with the module (single-block fast path).
    x_small = jax.random.normal(k_x, (2, C, 16, 16), dtype=jnp.float32)
    out_small = jax.block_until_ready(conv1x1_sigmoid(x_small, weight, bias))
    assert out_small.shape == (2, C, 16, 16)
    assert jnp.allclose(out_small, _reference(x_small, weight, bias), atol=1e-5)

    # Spec-sized input (1, 32, 128, 128): exercises the tiled / 2-step parallel path.
    x_spec = jax.random.normal(k_x2, (1, C, 128, 128), dtype=jnp.float32)
    out_spec = jax.block_until_ready(conv1x1_sigmoid(x_spec, weight, bias))
    assert out_spec.shape == (1, C, 128, 128)
    assert jnp.allclose(out_spec, _reference(x_spec, weight, bias), atol=1e-5)

    # Odd spatial size (10x10 -> HW=100): exercises the lane-padding path.
    x_odd = jax.random.normal(k_x3, (2, C, 10, 10), dtype=jnp.float32)
    out_odd = jax.block_until_ready(conv1x1_sigmoid(x_odd, weight, bias))
    assert out_odd.shape == (2, C, 10, 10)
    assert jnp.allclose(out_odd, _reference(x_odd, weight, bias), atol=1e-5)

    print("KERNEL_OK")
</pallas_src>

<mosaic_0001>
module attributes {stable_mosaic.version = 11 : i64} {
  func.func @conv1x1_sigmoid_kernel(%arg0: i32, %arg1: i32, %arg2: memref<2x32x256xf32, #tpu.memory_space<vmem>>, %arg3: memref<32x32xf32, #tpu.memory_space<vmem>>, %arg4: memref<32x1xf32, #tpu.memory_space<vmem>>, %arg5: memref<2x32x256xf32, #tpu.memory_space<vmem>>) attributes {dimension_semantics = [#tpu.dimension_semantics<parallel>, #tpu.dimension_semantics<parallel>], iteration_bounds = array<i64: 1, 1>, scalar_prefetch = 0 : i64, scratch_operands = 0 : i64, tpu.core_type = #tpu.core_type<tc>, window_params = [{transform_indices = @transform_0, window_bounds = array<i64: 2, 32, 256>}, {pipeline_mode = #tpu.pipeline_mode<synchronous>, transform_indices = @transform_1, window_bounds = array<i64: 32, 32>}, {pipeline_mode = #tpu.pipeline_mode<synchronous>, transform_indices = @transform_2, window_bounds = array<i64: 32, 1>}, {transform_indices = @transform_3, window_bounds = array<i64: 2, 32, 256>}]} {
    %c0 = arith.constant 0 : index
    %c0_0 = arith.constant 0 : index
    %0 = vector.load %arg3[%c0, %c0_0] : memref<32x32xf32, #tpu.memory_space<vmem>>, vector<32x32xf32>
    %c0_1 = arith.constant 0 : index
    %c0_2 = arith.constant 0 : index
    %1 = vector.load %arg4[%c0_1, %c0_2] : memref<32x1xf32, #tpu.memory_space<vmem>>, vector<32x1xf32>
    %c0_3 = arith.constant 0 : index
    %c0_4 = arith.constant 0 : index
    %c0_5 = arith.constant 0 : index
    %2 = vector.load %arg2[%c0_3, %c0_4, %c0_5] : memref<2x32x256xf32, #tpu.memory_space<vmem>>, vector<1x32x256xf32>
    %3 = vector.shape_cast %2 : vector<1x32x256xf32> to vector<32x256xf32>
    %cst = arith.constant dense<0.000000e+00> : vector<32x256xf32>
    %4 = tpu.matmul %0, %3, %cst {dimension_numbers = #tpu.dot_dimension_numbers<[1], [0], [0], [1], [0, 0, 1, 1], [], []>} : vector<32x32xf32>, vector<32x256xf32>, vector<32x256xf32> -> vector<32x256xf32>
    %5 = vector.broadcast %1 : vector<32x1xf32> to vector<32x256xf32>
    %6 = arith.addf %4, %5 : vector<32x256xf32>
    %7 = arith.negf %6 : vector<32x256xf32>
    %8 = math.exp %7 : vector<32x256xf32>
    %cst_6 = arith.constant 1.000000e+00 : f32
    %9 = vector.broadcast %cst_6 : f32 to vector<32x256xf32>
    %10 = arith.addf %9, %8 : vector<32x256xf32>
    %11 = arith.divf %9, %10 : vector<32x256xf32>
    %c0_7 = arith.constant 0 : index
    %c0_8 = arith.constant 0 : index
    %c0_9 = arith.constant 0 : index
    %12 = vector.load %arg5[%c0_7, %c0_8, %c0_9] : memref<2x32x256xf32, #tpu.memory_space<vmem>>, vector<1x32x256xf32>
    %13 = vector.shape_cast %12 : vector<1x32x256xf32> to vector<32x256xf32>
    %14 = vector.shape_cast %11 : vector<32x256xf32> to vector<1x32x256xf32>
    tpu.vector_store %arg5[%c0_7, %c0_8, %c0_9], %14 {strides = array<i32>} : memref<2x32x256xf32, #tpu.memory_space<vmem>>, vector<1x32x256xf32>,
    %c1 = arith.constant 1 : index
    %c0_10 = arith.constant 0 : index
    %c0_11 = arith.constant 0 : index
    %15 = vector.load %arg2[%c1, %c0_10, %c0_11] : memref<2x32x256xf32, #tpu.memory_space<vmem>>, vector<1x32x256xf32>
    %16 = vector.shape_cast %15 : vector<1x32x256xf32> to vector<32x256xf32>
    %cst_12 = arith.constant dense<0.000000e+00> : vector<32x256xf32>
    %17 = tpu.matmul %0, %16, %cst_12 {dimension_numbers = #tpu.dot_dimension_numbers<[1], [0], [0], [1], [0, 0, 1, 1], [], []>} : vector<32x32xf32>, vector<32x256xf32>, vector<32x256xf32> -> vector<32x256xf32>
    %18 = vector.broadcast %1 : vector<32x1xf32> to vector<32x256xf32>
    %19 = arith.addf %17, %18 : vector<32x256xf32>
    %20 = arith.negf %19 : vector<32x256xf32>
    %21 = math.exp %20 : vector<32x256xf32>
    %cst_13 = arith.constant 1.000000e+00 : f32
    %22 = vector.broadcast %cst_13 : f32 to vector<32x256xf32>
    %23 = arith.addf %22, %21 : vector<32x256xf32>
    %24 = arith.divf %22, %23 : vector<32x256xf32>
    %c1_14 = arith.constant 1 : index
    %c0_15 = arith.constant 0 : index
    %c0_16 = arith.constant 0 : index
    %25 = vector.load %arg5[%c1_14, %c0_15, %c0_16] : memref<2x32x256xf32, #tpu.memory_space<vmem>>, vector<1x32x256xf32>
    %26 = vector.shape_cast %25 : vector<1x32x256xf32> to vector<32x256xf32>
    %27 = vector.shape_cast %24 : vector<32x256xf32> to vector<1x32x256xf32>
    tpu.vector_store %arg5[%c1_14, %c0_15, %c0_16], %27 {strides = array<i32>} : memref<2x32x256xf32, #tpu.memory_space<vmem>>, vector<1x32x256xf32>,
    return
  }
  func.func @transform_0(%arg0: i32, %arg1: i32) -> (i32, i32, i32) {
    %c0_i32 = arith.constant 0 : i32
    %c0_i32_0 = arith.constant 0 : i32
    return %arg0, %c0_i32, %arg1 : i32, i32, i32
  }
  func.func @transform_1(%arg0: i32, %arg1: i32) -> (i32, i32) {
    %c0_i32 = arith.constant 0 : i32
    %c0_i32_0 = arith.constant 0 : i32
    %c0_i32_1 = arith.constant 0 : i32
    return %c0_i32, %c0_i32_0 : i32, i32
  }
  func.func @transform_2(%arg0: i32, %arg1: i32) -> (i32, i32) {
    %c0_i32 = arith.constant 0 : i32
    %c0_i32_0 = arith.constant 0 : i32
    %c0_i32_1 = arith.constant 0 : i32
    return %c0_i32, %c0_i32_0 : i32, i32
  }
  func.func @transform_3(%arg0: i32, %arg1: i32) -> (i32, i32, i32) {
    %c0_i32 = arith.constant 0 : i32
    %c0_i32_0 = arith.constant 0 : i32
    return %arg0, %c0_i32, %arg1 : i32, i32, i32
  }
}

</mosaic_0001>

<bundles_post_ra>
// kernel: tpu_custom_call.1
= control target key start
LH: loop header
LB: loop body
LE: loop exit
PB: predicated region body
PF: predicated region fallthrough
CT: control target
= control target key end

     0   :  { %8 = vsyncpa [#allocation3], 0  ;;  %s643_s0 = inlined_call_operand.hbm [shape: f32[2,32,256], index: 0, kind: input, shape index: {}]   ;;  %s644_s1 = inlined_call_operand.vmem [shape: f32[32,32], index: 1, kind: input, shape index: {}]   ;;  %s645_s2 = inlined_call_operand.vmem [shape: f32[32,1], index: 2, kind: input, shape index: {}]   ;;  %s646_s3 = inlined_call_operand.hbm [shape: f32[2,32,256], index: 3, kind: output, shape index: {}]  }
   0x1   :  { %9 = vsyncpa [#allocation4], 0  ;;  %s555_s12 = smov [#allocation2]   ;;  %s507_s16 = scalar_lea.hbm %s643_s0, 2048 }
   0x2   :  { %s15_s13 = sshll.u32 %s555_s12, 4  ;;  %p508_p0 = scmp.ne.s32.totalorder %s643_s0, %s507_s16  ;;  %s16_s13 = int_to_ptr.vmem [resolvable:$true] %s15_s13 }
   0x3   :  { %p511_p1 = scmp.lt.u32.totalorder %s507_s16, %s643_s0 }
   0x5   :  { %p513_p2 = pnand %p511_p1, %p508_p0 }
   0x7   :  { %516 = shalt.err (!%p513_p2)
}
   0x8   :  { %s517_s21 = scalar_lea.vmem %s16_s13, 2048  ;;  %p522_p4 = scmp.lt.s32.totalorder %s16_s13, %s16_s13 }
   0x9   :  { %p518_p3 = scmp.ne.s32.totalorder %s16_s13, %s517_s21  ;;  %p523_p5 = scmp.lt.s32.totalorder %s517_s21, %s517_s21 }
   0xb   :  { %p524_p6 = por %p523_p5, %p522_p4 }
   0xd   :  { %p525_p7 = pnand %p524_p6, %p518_p3 }
   0xf   :  { %528 = shalt.err (!%p525_p7)
}
  0x10   :  { %s556_s22 = smov 256   ;;  %s557_s23 = smov 16  }
  0x11   :  { %21 = dma.hbm_to_vmem [thread:$0]  %s643_s0, 2048, %s16_s13, [#allocation3], %s556_s22, %s556_s22, %s557_s23  }
  0x12   :  { %551 = dma.done.wait [#allocation3], 2048  }
  0x13   :  { %552 = vsyncadd [#allocation3], 4294965248  ;;  %v558_v0 = vmov 0.0   ;;  %v559_v1 = vmov 0   ;;  %v38_v2 = vld [vmem:[#allocation2 + $0x8] sm:$0xff]  ;;  %v40_v3 = vld [vmem:[#allocation2 + $0x18] sm:$0xff] }
  0x14   :  { %142 = vmatprep.mubr.f32.mxu0 %v558_v0  ;;  %296 = vmatprep.mubr.f32.mxu1 %v558_v0  ;;  %v225_v4 = vld [vmem:[#allocation2 + $0x48] sm:$0xff]  ;;  %v419_v5 = vpack.c.bf16 %v40_v3, %v38_v2  ;;  %v227_v6 = vld [vmem:[#allocation2 + $0x58] sm:$0xff]  ;;  %v37_v7 = vld [vmem:[#allocation2] sm:$0xff]  ;;  %vm65_vm0 = vcmask 261120  }
  0x15   :  { %441 = vset.pattern.permute.xlu0 %v559_v1  ;;  %442 = vset.pattern.permute.xlu1 %v559_v1  ;;  %v39_v8 = vld [vmem:[#allocation2 + $0x10] sm:$0xff]  ;;  %v427_v9 = vpack.c.bf16 %v227_v6, %v225_v4  ;;  %v224_v11 = vld [vmem:[#allocation2 + $0x40] sm:$0xff]  ;;  %v42_v13 = vld [vmem:[#allocation2 + $0x28] sm:$0xff] }
  0x16   :  { %v421_v10 = vpack.c.bf16 %v39_v8, %v37_v7  ;;  %v226_v12 = vld [vmem:[#allocation2 + $0x50] sm:$0xff]  ;;  %420 = vmatprep.subr.bf16.mxu0 %v419_v5  ;;  %v44_v15 = vld [vmem:[#allocation2 + $0x38] sm:$0xff]  ;;  %v229_v16 = vld [vmem:[#allocation2 + $0x68] sm:$0xff] }
  0x17   :  { %v429_v14 = vpack.c.bf16 %v226_v12, %v224_v11  ;;  %v231_v17 = vld [vmem:[#allocation2 + $0x78] sm:$0xff]  ;;  %428 = vmatprep.subr.bf16.mxu1 %v427_v9  ;;  %v423_v18 = vpack.c.bf16 %v44_v15, %v42_v13  ;;  %v41_v20 = vld [vmem:[#allocation2 + $0x20] sm:$0xff]  ;;  %v43_v21 = vld [vmem:[#allocation2 + $0x30] sm:$0xff] }
  0x18   :  { %422 = vmatpush1.bf16.msra.mxu0 %v421_v10  ;;  %v431_v19 = vpack.c.bf16 %v231_v17, %v229_v16  ;;  %v228_v22 = vld [vmem:[#allocation2 + $0x60] sm:$0xff]  ;;  %v425_v23 = vpack.c.bf16 %v43_v21, %v41_v20  ;;  %v230_v24 = vld [vmem:[#allocation2 + $0x70] sm:$0xff]  ;;  %v34_v29 = vld [vmem:[%s645_s2 + $0x8] sm:$0xff] }
  0x19   :  { %430 = vmatpush1.bf16.msra.mxu1 %v429_v14  ;;  %424 = vmatprep.subr.bf16.mxu0 %v423_v18  ;;  %v433_v25 = vpack.c.bf16 %v230_v24, %v228_v22  ;;  %v33_v26 = vld [vmem:[%s645_s2] sm:$0xff]  ;;  %v35_v27 = vld [vmem:[%s645_s2 + $0x10] sm:$0xff]  ;;  %v36_v30 = vld [vmem:[%s645_s2 + $0x18] sm:$0xff] }
  0x1a   :  { %432 = vmatprep.subr.bf16.mxu1 %v431_v19  ;;  %47 = vperm.xlu0 %441, %v33_v26   ;;  %v29_v28 = vld [vmem:[%s644_s1] sm:$0xff]  ;;  %v30_v31 = vld [vmem:[%s644_s1 + $0x8] sm:$0xff]  ;;  %v31_v32 = vld [vmem:[%s644_s1 + $0x10] sm:$0xff] }
  0x1b   :  { %57 = vperm.xlu1 %442, %v35_v27   ;;  %v32_v33 = vld [vmem:[%s644_s1 + $0x18] sm:$0xff]  ;;  %s560_s1 = smov [#allocation5]  }
  0x1c   :  { %426 = vmatpush1.bf16.msra.mxu0 %v425_v23  ;;  %s383_s13 = sshll.u32 %s560_s1, 4  ;;  %s384_s13 = int_to_ptr.vmem [resolvable:$true] %s383_s13 }
  0x1d   :  { %434 = vmatpush1.bf16.msra.mxu1 %v433_v25  ;;  %s529_s14 = scalar_lea.vmem %s384_s13, 2048  ;;  %p534_p9 = scmp.lt.s32.totalorder %s384_s13, %s384_s13 }
  0x1e   :  { %52 = vperm.xlu0 %441, %v34_v29   ;;  %p530_p8 = scmp.ne.s32.totalorder %s384_s13, %s529_s14  ;;  %p535_p10 = scmp.lt.s32.totalorder %s529_s14, %s529_s14 }
  0x1f   :  { %395 = vmatmul.mubr.msk.f32.vlgmr.msra.gmra.mrb[0].mxu0 %vm65_vm0, %v29_v28  ;;  %62 = vperm.xlu1 %442, %v36_v30  }
  0x20   :  { %407 = vmatmul.mubr.msk.f32.vlgmr.msra.gmra.mrb[0].mxu1 %vm65_vm0, %v29_v28  ;;  %148 = vmatprep.mubr.f32.mxu0 %v558_v0  ;;  %p536_p11 = por %p535_p10, %p534_p9 }
  0x21   :  { %302 = vmatprep.mubr.f32.mxu1 %v558_v0 }
  0x22   :  { %p537_p12 = pnand %p536_p11, %p530_p8 }
  0x23   :  { %396 = vmatmul.mubr.msk.f32.gmra.mrb[2].mxu0 %vm65_vm0, %v30_v31 }
  0x24   :  { %408 = vmatmul.mubr.msk.f32.gmra.mrb[2].mxu1 %vm65_vm0, %v30_v31  ;;  %154 = vmatprep.mubr.f32.mxu0 %v558_v0 }
  0x25   :  { %308 = vmatprep.mubr.f32.mxu1 %v558_v0 }
  0x27   :  { %397 = vmatmul.mubr.msk.f32.gmra.mrb[4].mxu0 %vm65_vm0, %v31_v32 }
  0x28   :  { %409 = vmatmul.mubr.msk.f32.gmra.mrb[4].mxu1 %vm65_vm0, %v31_v32  ;;  %160 = vmatprep.mubr.f32.mxu0 %v558_v0 }
  0x29   :  { %314 = vmatprep.mubr.f32.mxu1 %v558_v0 }
  0x2b   :  { %398 = vmatmul.mubr.msk.f32.gmra.mrb[6].mxu0 %vm65_vm0, %v32_v33 }
  0x2c   :  { %410 = vmatmul.mubr.msk.f32.gmra.mrb[6].mxu1 %vm65_vm0, %v32_v33 }
  0x99   :  { %v48_v34 = vpop.permute.xlu0 %47 }
  0x9a   :  { %v58_v53 = vpop.permute.xlu1 %57 }
  0x9d   :  { %v53_v42 = vpop.permute.xlu0 %52 }
  0x9e   :  { %v63_v7 = vpop.permute.xlu1 %62 }
  0xf2   :  { %v144_v35 = vpop.f32.mrb[0].mxu0 }
  0xf3   :  { %v145_v36 = vadd.f32 %v144_v35, %v48_v34  ;;  %v298_v37 = vpop.f32.mrb[0].mxu1  ;;  %v146_v38 = vpop.f32.mrb[1].mxu0 }
  0xf4   :  { %v299_v39 = vadd.f32 %v298_v37, %v48_v34  ;;  %v147_v40 = vadd.f32 %v146_v38, %v48_v34  ;;  %v300_v41 = vpop.f32.mrb[1].mxu1 }
  0xf5   :  { %v399_v43 = vmul.f32 -1.442695, %v145_v36  ;;  %v301_v44 = vadd.f32 %v300_v41, %v48_v34 }
  0xf6   :  { %v411_v45 = vmul.f32 -1.442695, %v299_v39  ;;  %v400_v46 = vmul.f32 -1.442695, %v147_v40  ;;  %v150_v47 = vpop.f32.mrb[2].mxu0 }
  0xf7   :  { %443 = vpow2.f32 %v399_v43  ;;  %v412_v48 = vmul.f32 -1.442695, %v301_v44  ;;  %v151_v49 = vadd.f32 %v150_v47, %v53_v42  ;;  %v304_v50 = vpop.f32.mrb[2].mxu1  ;;  %v152_v51 = vpop.f32.mrb[3].mxu0 }
  0xf8   :  { %445 = vpow2.f32 %v411_v45  ;;  %v305_v52 = vadd.f32 %v304_v50, %v53_v42  ;;  %v153_v54 = vadd.f32 %v152_v51, %v53_v42  ;;  %v306_v55 = vpop.f32.mrb[3].mxu1 }
  0xf9   :  { %447 = vpow2.f32 %v400_v46  ;;  %v401_v56 = vmul.f32 -1.442695, %v151_v49  ;;  %v307_v57 = vadd.f32 %v306_v55, %v53_v42 }
  0xfa   :  { %449 = vpow2.f32 %v412_v48  ;;  %v413_v58 = vmul.f32 -1.442695, %v305_v52  ;;  %v402_v59 = vmul.f32 -1.442695, %v153_v54  ;;  %v156_v60 = vpop.f32.mrb[4].mxu0 }
  0xfb   :  { %451 = vpow2.f32 %v401_v56  ;;  %v414_v61 = vmul.f32 -1.442695, %v307_v57  ;;  %v157_v62 = vadd.f32 %v156_v60, %v58_v53  ;;  %v310_v63 = vpop.f32.mrb[4].mxu1  ;;  %v158_v0 = vpop.f32.mrb[5].mxu0 }
  0xfc   :  { %453 = vpow2.f32 %v413_v58  ;;  %v311_v1 = vadd.f32 %v310_v63, %v58_v53  ;;  %v159_v2 = vadd.f32 %v158_v0, %v58_v53  ;;  %v312_v3 = vpop.f32.mrb[5].mxu1 }
  0xfd   :  { %455 = vpow2.f32 %v402_v59  ;;  %v403_v4 = vmul.f32 -1.442695, %v157_v62  ;;  %v313_v5 = vadd.f32 %v312_v3, %v58_v53 }
  0xfe   :  { %457 = vpow2.f32 %v414_v61  ;;  %v415_v6 = vmul.f32 -1.442695, %v311_v1  ;;  %v404_v8 = vmul.f32 -1.442695, %v159_v2  ;;  %v162_v9 = vpop.f32.mrb[6].mxu0 }
  0xff   :  { %459 = vpow2.f32 %v403_v4  ;;  %v416_v10 = vmul.f32 -1.442695, %v313_v5  ;;  %v163_v11 = vadd.f32 %v162_v9, %v63_v7  ;;  %v316_v12 = vpop.f32.mrb[6].mxu1  ;;  %v164_v13 = vpop.f32.mrb[7].mxu0 }
 0x100   :  { %461 = vpow2.f32 %v415_v6  ;;  %v318_v14 = vpop.f32.mrb[7].mxu1  ;;  %v317_v33 = vadd.f32 %v316_v12, %v63_v7  ;;  %v165_v36 = vadd.f32 %v164_v13, %v63_v7 }
 0x101   :  { %v444_v15 = vpop.eup %443  ;;  %463 = vpow2.f32 %v404_v8  ;;  %v405_v16 = vmul.f32 -1.442695, %v163_v11  ;;  %v319_v39 = vadd.f32 %v318_v14, %v63_v7 }
 0x102   :  { %v446_v17 = vpop.eup %445  ;;  %v191_v18 = vadd.f32 1.0, %v444_v15  ;;  %465 = vpow2.f32 %v416_v10  ;;  %v417_v44 = vmul.f32 -1.442695, %v317_v33  ;;  %v406_v47 = vmul.f32 -1.442695, %v165_v36 }
 0x103   :  { %v448_v19 = vpop.eup %447  ;;  %v345_v20 = vadd.f32 1.0, %v446_v17  ;;  %467 = vpow2.f32 %v405_v16  ;;  %v418_v49 = vmul.f32 -1.442695, %v319_v39 }
 0x104   :  { %v450_v21 = vpop.eup %449  ;;  %469 = vrcp.f32 %v191_v18  ;;  %v192_v22 = vadd.f32 1.0, %v448_v19 }
 0x105   :  { %v452_v23 = vpop.eup %451  ;;  %471 = vrcp.f32 %v345_v20  ;;  %v346_v24 = vadd.f32 1.0, %v450_v21 }
 0x106   :  { %v454_v25 = vpop.eup %453  ;;  %473 = vrcp.f32 %v192_v22  ;;  %v193_v26 = vadd.f32 1.0, %v452_v23 }
 0x107   :  { %v456_v27 = vpop.eup %455  ;;  %475 = vrcp.f32 %v346_v24  ;;  %v347_v28 = vadd.f32 1.0, %v454_v25 }
 0x108   :  { %v458_v29 = vpop.eup %457  ;;  %477 = vrcp.f32 %v193_v26  ;;  %v194_v30 = vadd.f32 1.0, %v456_v27 }
 0x109   :  { %v460_v31 = vpop.eup %459  ;;  %479 = vrcp.f32 %v347_v28  ;;  %v348_v32 = vadd.f32 1.0, %v458_v29 }
 0x10a   :  { %v462_v34 = vpop.eup %461  ;;  %481 = vrcp.f32 %v194_v30  ;;  %v195_v35 = vadd.f32 1.0, %v460_v31 }
 0x10b   :  { %v464_v37 = vpop.eup %463  ;;  %483 = vrcp.f32 %v348_v32  ;;  %v349_v38 = vadd.f32 1.0, %v462_v34 }
 0x10c   :  { %v466_v40 = vpop.eup %465  ;;  %485 = vrcp.f32 %v195_v35  ;;  %v196_v41 = vadd.f32 1.0, %v464_v37 }
 0x10d   :  { %v468_v42 = vpop.eup %467  ;;  %487 = vrcp.f32 %v349_v38  ;;  %v350_v43 = vadd.f32 1.0, %v466_v40 }
 0x10e   :  { %v470_v45 = vpop.eup %469  ;;  %489 = vrcp.f32 %v196_v41  ;;  %v197_v46 = vadd.f32 1.0, %v468_v42 }
 0x10f   :  { %v472_v48 = vpop.eup %471  ;;  %215 = vst [vmem:[#allocation5] sm:$0xff] %v470_v45  ;;  %491 = vrcp.f32 %v350_v43 }
 0x110   :  { %v474_v50 = vpop.eup %473  ;;  %370 = vst [vmem:[#allocation5 + $0x40] sm:$0xff] %v472_v48  ;;  %493 = vrcp.f32 %v197_v46 }
 0x111   :  { %v476_v51 = vpop.eup %475  ;;  %216 = vst [vmem:[#allocation5 + $0x8] sm:$0xff] %v474_v50  ;;  %495 = vpow2.f32 %v417_v44 }
 0x112   :  { %v478_v52 = vpop.eup %477  ;;  %371 = vst [vmem:[#allocation5 + $0x48] sm:$0xff] %v476_v51  ;;  %497 = vpow2.f32 %v406_v47 }
 0x113   :  { %v480_v53 = vpop.eup %479  ;;  %217 = vst [vmem:[#allocation5 + $0x10] sm:$0xff] %v478_v52  ;;  %499 = vpow2.f32 %v418_v49 }
 0x114   :  { %v482_v54 = vpop.eup %481  ;;  %372 = vst [vmem:[#allocation5 + $0x50] sm:$0xff] %v480_v53 }
 0x115   :  { %v484_v55 = vpop.eup %483  ;;  %218 = vst [vmem:[#allocation5 + $0x18] sm:$0xff] %v482_v54 }
 0x116   :  { %v486_v56 = vpop.eup %485  ;;  %373 = vst [vmem:[#allocation5 + $0x58] sm:$0xff] %v484_v55 }
 0x117   :  { %v488_v57 = vpop.eup %487  ;;  %219 = vst [vmem:[#allocation5 + $0x20] sm:$0xff] %v486_v56 }
 0x118   :  { %v490_v58 = vpop.eup %489  ;;  %374 = vst [vmem:[#allocation5 + $0x60] sm:$0xff] %v488_v57 }
 0x119   :  { %v492_v59 = vpop.eup %491  ;;  %220 = vst [vmem:[#allocation5 + $0x28] sm:$0xff] %v490_v58 }
 0x11a   :  { %v494_v60 = vpop.eup %493  ;;  %375 = vst [vmem:[#allocation5 + $0x68] sm:$0xff] %v492_v59 }
 0x11b   :  { %v496_v61 = vpop.eup %495  ;;  %221 = vst [vmem:[#allocation5 + $0x30] sm:$0xff] %v494_v60 }
 0x11c   :  { %v498_v62 = vpop.eup %497  ;;  %v351_v63 = vadd.f32 1.0, %v496_v61 }
 0x11d   :  { %v500_v0 = vpop.eup %499  ;;  %v198_v1 = vadd.f32 1.0, %v498_v62 }
 0x11e   :  { %501 = vrcp.f32 %v351_v63  ;;  %v352_v2 = vadd.f32 1.0, %v500_v0 }
 0x11f   :  { %503 = vrcp.f32 %v198_v1 }
 0x120   :  { %505 = vrcp.f32 %v352_v2 }
 0x128   :  { %v502_v3 = vpop.eup %501 }
 0x129   :  { %v504_v4 = vpop.eup %503  ;;  %376 = vst [vmem:[#allocation5 + $0x70] sm:$0xff] %v502_v3 }
 0x12a   :  { %v506_v5 = vpop.eup %505  ;;  %222 = vst [vmem:[#allocation5 + $0x38] sm:$0xff] %v504_v4 }
 0x12b   :  { %377 = vst [vmem:[#allocation5 + $0x78] sm:$0xff] %v506_v5 }
 0x12c   :  { %540 = shalt.err (!%p537_p12)
}
 0x12d   :  { %s541_s17 = scalar_lea.hbm %s646_s3, 2048 }
 0x12e   :  { %p542_p13 = scmp.ne.s32.totalorder %s646_s3, %s541_s17  ;;  %p545_p0 = scmp.lt.u32.totalorder %s541_s17, %s646_s3 }
 0x130   :  { %p547_p1 = pnand %p545_p0, %p542_p13 }
 0x132   :  { %550 = shalt.err (!%p547_p1)
}
 0x133   :  { %389 = dma.vmem_to_hbm [thread:$0]  %s384_s13, 2048, %s646_s3, [#allocation4], %s556_s22, %s556_s22, %s557_s23  }
 0x134   :  { %553 = dma.done.wait [#allocation4], 2048  }
 0x135   :  { %554 = vsyncadd [#allocation4], 4294965248 }
 0x136   :  { %393 = vsyncpa [#allocation3], 1 }
 0x137   :  { %394 = vsyncpa [#allocation4], 1 }

</bundles_post_ra>
